<compile_context>
chip_gen: v7x
topology: tpu7x:2x2x1
jax: 0.10.0
libtpu: 0.0.40
codegen_flags: <defaults>
</compile_context>

<pallas_src>
import functools
import numpy as np
import jax
import jax.numpy as jnp
from jax.experimental import pallas as pl
from jax.experimental.pallas import tpu as pltpu


# ---------------- spatial operator construction (host-side, cached) ----------
def _pool_matrix(in_size, k, s):
    out_size = (in_size - k) // s + 1
    P = np.zeros((out_size, in_size), np.float32)
    for o in range(out_size):
        P[o, o * s:o * s + k] = 1.0 / k
    return P


def _upsample_matrix(in_size, out_size):
    # bilinear, align_corners=True (per-axis 1-D interpolation matrix)
    A = np.zeros((out_size, in_size), np.float32)
    if in_size == 1:
        A[:, 0] = 1.0
        return A
    scale = (in_size - 1) / (out_size - 1)
    for i in range(out_size):
        src = i * scale
        i0 = int(np.floor(src))
        i1 = min(i0 + 1, in_size - 1)
        frac = src - i0
        A[i, i0] += 1.0 - frac
        A[i, i1] += frac
    return A


@functools.lru_cache(maxsize=None)
def _fused_spatial_operator(H, W, Th, Tw, pool_list):
    """K_l^T for every level, concatenated along the output (lane) axis.

    K_l = kron(A_h @ P_h, A_w @ P_w) maps the flattened (H*W,) input to the
    flattened (Th*Tw,) pooled+upsampled output.  Returns (H*W, L*Th*Tw) bf16.
    Stored in bf16: it is the dominant HBM->VMEM stream and the MXU truncates
    to bf16 at default precision anyway, so this halves DMA bytes for free.
    # TODO(synk): for large H,W the fused K^T grows as (H*W)^2 per level and
    # would exceed v7x's 64 MiB VMEM -- switch to the separable per-axis form
    # (two thin matmuls per level) and a lane-tiled "parallel" grid there.
    """
    kts = []
    for (k, s) in pool_list:
        Sh = _upsample_matrix((H - k) // s + 1, Th) @ _pool_matrix(H, k, s)
        Sw = _upsample_matrix((W - k) // s + 1, Tw) @ _pool_matrix(W, k, s)
        kts.append(np.kron(Sh, Sw).T.astype(np.float32))     # (H*W, Th*Tw)
    kt = np.concatenate(kts, axis=1)                          # (H*W, L*Th*Tw)
    return jnp.asarray(kt, dtype=jnp.bfloat16)


# ------------------------------- Pallas kernel --------------------------------
def _make_ppm_kernel(N, C, HW, L):
    def kernel(x_ref, kt_ref, w_ref, b_ref, o_ref):
        # x_ref : (N*C, HW)   f32, batch stacked on the sublane axis
        # kt_ref: (HW, L*HW)  bf16, fused avg_pool + bilinear upsample per level
        # w_ref : (L, C, C)   f32, 1x1 conv weights
        # b_ref : (L, C, 1)   f32, 1x1 conv bias
        # o_ref : (N, (1+L)*C, HW) f32, final concatenated (torch.cat) layout
        x2 = x_ref[...]                                       # (N*C, HW) f32

        # identity branch of the concat: one full-width, lane-dense store
        o_ref[:, 0:C, :] = x2.reshape(N, C, HW)

        # one lane-dense MXU matmul performs pool+upsample for every level
        y = jnp.dot(x2.astype(jnp.bfloat16), kt_ref[...],
                    preferred_element_type=jnp.float32)       # (N*C, L*HW)

        # per-level channel mix + bias, one store per concat block
        for l in range(L):
            yl = y[:, l * HW:(l + 1) * HW]                    # (N*C, HW)
            zl = jnp.concatenate(
                [jnp.dot(w_ref[l], yl[n * C:(n + 1) * C, :],
                         preferred_element_type=jnp.float32) + b_ref[l]
                 for n in range(N)], axis=0)                  # (N*C, HW)
            o_ref[:, (l + 1) * C:(l + 2) * C, :] = zl.reshape(N, C, HW)

    return kernel


# --------------------------------- wrapper -------------------------------------
def pyramid_pooling_forward(x, pool_list, conv_w, conv_b, size):
    """x: (N, C, H, W) float32 (NCHW, as in PyTorch)."""
    N, C, H, W = x.shape
    Th, Tw = size
    L = len(pool_list)
    HW = H * W
    assert (Th, Tw) == (H, W), "concat along channels requires upsample size == input size"
    assert C % 8 == 0, "channel blocks must be sublane-aligned (C % 8 == 0)"
    assert HW % 128 == 0, "flattened spatial dim must be lane-aligned (H*W % 128 == 0)"

    kt_cat = _fused_spatial_operator(H, W, Th, Tw,
                                     tuple(tuple(p) for p in pool_list))  # (HW, L*HW) bf16

    w = jnp.stack([wi.astype(jnp.float32) for wi in conv_w])              # (L, C, C)
    b = jnp.stack([bi.astype(jnp.float32)[:, None] for bi in conv_b])     # (L, C, 1)
    x2 = x.reshape(N * C, HW)                                             # f32

    # Advisory cost estimate for XLA scheduling around the custom call.
    flops = 2 * (N * C) * HW * (L * HW) + 2 * L * N * C * C * HW
    bytes_accessed = (N * C * HW * 4          # x2 (f32)
                      + HW * L * HW * 2       # kt_cat (bf16)
                      + L * C * C * 4         # weights
                      + L * C * 4             # bias
                      + N * (1 + L) * C * HW * 4)  # output

    # Single invocation: the whole working set fits VMEM on every TPU
    # generation, so no grid / pipelining is needed.
    # TODO(synk): for larger N or H,W, add a "parallel" grid axis (batch or
    # lane tiles of kt_cat) so v7x's second TensorCore is used and VMEM tiles
    # stay under its 64 MiB.
    out = pl.pallas_call(
        _make_ppm_kernel(N, C, HW, L),
        out_shape=jax.ShapeDtypeStruct((N, (1 + L) * C, HW), jnp.float32),
        in_specs=[pl.BlockSpec(memory_space=pltpu.MemorySpace.VMEM)] * 4,
        out_specs=pl.BlockSpec(memory_space=pltpu.MemorySpace.VMEM),
        cost_estimate=pl.CostEstimate(flops=int(flops), transcendentals=0,
                                      bytes_accessed=int(bytes_accessed)),
    )(x2, kt_cat, w, b)

    return out.reshape(N, (1 + L) * C, H, W)


# ----------------------------- pure-JAX reference --------------------------------
def _bilinear_align_corners(arr, out_size):
    def interp(a, axis, osz):
        isz = a.shape[axis]
        if isz == 1:
            return jnp.repeat(a, osz, axis=axis)
        src = jnp.arange(osz) * ((isz - 1) / (osz - 1))
        i0 = jnp.floor(src).astype(jnp.int32)
        i1 = jnp.minimum(i0 + 1, isz - 1)
        frac = (src - i0).astype(a.dtype)
        shape = [1] * a.ndim
        shape[axis] = osz
        frac = frac.reshape(shape)
        a0 = jnp.take(a, i0, axis=axis)
        a1 = jnp.take(a, i1, axis=axis)
        return a0 * (1 - frac) + a1 * frac

    a = interp(arr, 2, out_size[0])
    a = interp(a, 3, out_size[1])
    return a


def reference_forward(x, pool_list, conv_w, conv_b, size):
    cat = [x]
    for (k, s), w, b in zip(pool_list, conv_w, conv_b):
        pooled = jax.lax.reduce_window(
            x, 0.0, jax.lax.add, (1, 1, k, k), (1, 1, s, s), "VALID") / float(k * k)
        conv = jnp.einsum("oc,nchw->nohw", w, pooled,
                          precision=jax.lax.Precision.HIGHEST) + b[None, :, None, None]
        cat.append(_bilinear_align_corners(conv, size))
    return jnp.concatenate(cat, axis=1)


# ------------------------------------ main ----------------------------------------
if __name__ == "__main__":
    N, C, H, W = 2, 8, 16, 16
    size = (16, 16)
    pool_list = [(2, 2), (4, 4), (8, 8)]
    L = len(pool_list)

    key = jax.random.PRNGKey(0)
    keys = jax.random.split(key, 1 + 2 * L)
    x = jax.random.normal(keys[0], (N, C, H, W), jnp.float32)
    conv_w = [jax.random.normal(keys[1 + 2 * i], (C, C), jnp.float32) / np.sqrt(C)
              for i in range(L)]
    conv_b = [0.1 * jax.random.normal(keys[2 + 2 * i], (C,), jnp.float32)
              for i in range(L)]
    # NOTE: the module defines self.relu but never applies it in forward(),
    # so no ReLU is applied here either.

    out = pyramid_pooling_forward(x, pool_list, conv_w, conv_b, size)
    out = jax.block_until_ready(out)

    ref = reference_forward(x, pool_list, conv_w, conv_b, size)
    assert out.shape == (N, C * (1 + L), size[0], size[1]), out.shape
    # Kernel matmuls use bf16 operands / single-pass MXU precision (same
    # numerics as default f32 precision on TPU), so compare against the f32
    # reference with a correspondingly relaxed tolerance.
    np.testing.assert_allclose(np.asarray(out), np.asarray(ref), rtol=5e-3, atol=2e-3)
    print("KERNEL_OK")
</pallas_src>

<mosaic_0001>
module attributes {stable_mosaic.version = 11 : i64} {
  func.func @kernel(%arg0: memref<16x256xf32, #tpu.memory_space<vmem>>, %arg1: memref<256x768xbf16, #tpu.memory_space<vmem>>, %arg2: memref<3x8x8xf32, #tpu.memory_space<vmem>>, %arg3: memref<3x8x1xf32, #tpu.memory_space<vmem>>, %arg4: memref<2x32x256xf32, #tpu.memory_space<vmem>>) attributes {dimension_semantics = [], scalar_prefetch = 0 : i64, scratch_operands = 0 : i64, tpu.core_type = #tpu.core_type<tc>} {
    %c0 = arith.constant 0 : index
    %c0_0 = arith.constant 0 : index
    %0 = vector.load %arg0[%c0, %c0_0] : memref<16x256xf32, #tpu.memory_space<vmem>>, vector<16x256xf32>
    %1 = vector.shape_cast %0 : vector<16x256xf32> to vector<2x8x256xf32>
    %c0_1 = arith.constant 0 : index
    %c0_2 = arith.constant 0 : index
    %c0_3 = arith.constant 0 : index
    %2 = vector.load %arg4[%c0_1, %c0_2, %c0_3] : memref<2x32x256xf32, #tpu.memory_space<vmem>>, vector<2x8x256xf32>
    tpu.vector_store %arg4[%c0_1, %c0_2, %c0_3], %1 {strides = array<i32>} : memref<2x32x256xf32, #tpu.memory_space<vmem>>, vector<2x8x256xf32>,
    %3 = arith.truncf %0 : vector<16x256xf32> to vector<16x256xbf16>
    %c0_4 = arith.constant 0 : index
    %c0_5 = arith.constant 0 : index
    %4 = vector.load %arg1[%c0_4, %c0_5] : memref<256x768xbf16, #tpu.memory_space<vmem>>, vector<256x768xbf16>
    %cst = arith.constant dense<0.000000e+00> : vector<16x768xf32>
    %5 = tpu.matmul %3, %4, %cst {dimension_numbers = #tpu.dot_dimension_numbers<[1], [0], [0], [1], [0, 0, 1, 1], [], []>} : vector<16x256xbf16>, vector<256x768xbf16>, vector<16x768xf32> -> vector<16x768xf32>
    %6 = vector.extract_strided_slice %5 {offsets = [0, 0], sizes = [16, 256], strides = [1, 1]} : vector<16x768xf32> to vector<16x256xf32>
    %c0_6 = arith.constant 0 : index
    %c0_7 = arith.constant 0 : index
    %c0_8 = arith.constant 0 : index
    %7 = vector.load %arg2[%c0_6, %c0_7, %c0_8] : memref<3x8x8xf32, #tpu.memory_space<vmem>>, vector<1x8x8xf32>
    %8 = vector.shape_cast %7 : vector<1x8x8xf32> to vector<8x8xf32>
    %9 = vector.extract_strided_slice %6 {offsets = [0, 0], sizes = [8, 256], strides = [1, 1]} : vector<16x256xf32> to vector<8x256xf32>
    %cst_9 = arith.constant dense<0.000000e+00> : vector<8x256xf32>
    %10 = tpu.matmul %8, %9, %cst_9 {dimension_numbers = #tpu.dot_dimension_numbers<[1], [0], [0], [1], [0, 0, 1, 1], [], []>} : vector<8x8xf32>, vector<8x256xf32>, vector<8x256xf32> -> vector<8x256xf32>
    %c0_10 = arith.constant 0 : index
    %c0_11 = arith.constant 0 : index
    %c0_12 = arith.constant 0 : index
    %11 = vector.load %arg3[%c0_10, %c0_11, %c0_12] : memref<3x8x1xf32, #tpu.memory_space<vmem>>, vector<1x8x1xf32>
    %12 = vector.shape_cast %11 : vector<1x8x1xf32> to vector<8x1xf32>
    %13 = vector.broadcast %12 : vector<8x1xf32> to vector<8x256xf32>
    %14 = arith.addf %10, %13 : vector<8x256xf32>
    %c0_13 = arith.constant 0 : index
    %c0_14 = arith.constant 0 : index
    %c0_15 = arith.constant 0 : index
    %15 = vector.load %arg2[%c0_13, %c0_14, %c0_15] : memref<3x8x8xf32, #tpu.memory_space<vmem>>, vector<1x8x8xf32>
    %16 = vector.shape_cast %15 : vector<1x8x8xf32> to vector<8x8xf32>
    %17 = vector.extract_strided_slice %6 {offsets = [8, 0], sizes = [8, 256], strides = [1, 1]} : vector<16x256xf32> to vector<8x256xf32>
    %cst_16 = arith.constant dense<0.000000e+00> : vector<8x256xf32>
    %18 = tpu.matmul %16, %17, %cst_16 {dimension_numbers = #tpu.dot_dimension_numbers<[1], [0], [0], [1], [0, 0, 1, 1], [], []>} : vector<8x8xf32>, vector<8x256xf32>, vector<8x256xf32> -> vector<8x256xf32>
    %c0_17 = arith.constant 0 : index
    %c0_18 = arith.constant 0 : index
    %c0_19 = arith.constant 0 : index
    %19 = vector.load %arg3[%c0_17, %c0_18, %c0_19] : memref<3x8x1xf32, #tpu.memory_space<vmem>>, vector<1x8x1xf32>
    %20 = vector.shape_cast %19 : vector<1x8x1xf32> to vector<8x1xf32>
    %21 = vector.broadcast %20 : vector<8x1xf32> to vector<8x256xf32>
    %22 = arith.addf %18, %21 : vector<8x256xf32>
    %23 = tpu.concatenate %14, %22 in 0 : vector<8x256xf32>, vector<8x256xf32> -> vector<16x256xf32>
    %24 = vector.shape_cast %23 : vector<16x256xf32> to vector<2x8x256xf32>
    %c0_20 = arith.constant 0 : index
    %c8 = arith.constant 8 : index
    %c0_21 = arith.constant 0 : index
    %25 = vector.load %arg4[%c0_20, %c8, %c0_21] : memref<2x32x256xf32, #tpu.memory_space<vmem>>, vector<2x8x256xf32>
    tpu.vector_store %arg4[%c0_20, %c8, %c0_21], %24 {strides = array<i32>} : memref<2x32x256xf32, #tpu.memory_space<vmem>>, vector<2x8x256xf32>,
    %26 = vector.extract_strided_slice %5 {offsets = [0, 256], sizes = [16, 256], strides = [1, 1]} : vector<16x768xf32> to vector<16x256xf32>
    %c1 = arith.constant 1 : index
    %c0_22 = arith.constant 0 : index
    %c0_23 = arith.constant 0 : index
    %27 = vector.load %arg2[%c1, %c0_22, %c0_23] : memref<3x8x8xf32, #tpu.memory_space<vmem>>, vector<1x8x8xf32>
    %28 = vector.shape_cast %27 : vector<1x8x8xf32> to vector<8x8xf32>
    %29 = vector.extract_strided_slice %26 {offsets = [0, 0], sizes = [8, 256], strides = [1, 1]} : vector<16x256xf32> to vector<8x256xf32>
    %cst_24 = arith.constant dense<0.000000e+00> : vector<8x256xf32>
    %30 = tpu.matmul %28, %29, %cst_24 {dimension_numbers = #tpu.dot_dimension_numbers<[1], [0], [0], [1], [0, 0, 1, 1], [], []>} : vector<8x8xf32>, vector<8x256xf32>, vector<8x256xf32> -> vector<8x256xf32>
    %c1_25 = arith.constant 1 : index
    %c0_26 = arith.constant 0 : index
    %c0_27 = arith.constant 0 : index
    %31 = vector.load %arg3[%c1_25, %c0_26, %c0_27] : memref<3x8x1xf32, #tpu.memory_space<vmem>>, vector<1x8x1xf32>
    %32 = vector.shape_cast %31 : vector<1x8x1xf32> to vector<8x1xf32>
    %33 = vector.broadcast %32 : vector<8x1xf32> to vector<8x256xf32>
    %34 = arith.addf %30, %33 : vector<8x256xf32>
    %c1_28 = arith.constant 1 : index
    %c0_29 = arith.constant 0 : index
    %c0_30 = arith.constant 0 : index
    %35 = vector.load %arg2[%c1_28, %c0_29, %c0_30] : memref<3x8x8xf32, #tpu.memory_space<vmem>>, vector<1x8x8xf32>
    %36 = vector.shape_cast %35 : vector<1x8x8xf32> to vector<8x8xf32>
    %37 = vector.extract_strided_slice %26 {offsets = [8, 0], sizes = [8, 256], strides = [1, 1]} : vector<16x256xf32> to vector<8x256xf32>
    %cst_31 = arith.constant dense<0.000000e+00> : vector<8x256xf32>
    %38 = tpu.matmul %36, %37, %cst_31 {dimension_numbers = #tpu.dot_dimension_numbers<[1], [0], [0], [1], [0, 0, 1, 1], [], []>} : vector<8x8xf32>, vector<8x256xf32>, vector<8x256xf32> -> vector<8x256xf32>
    %c1_32 = arith.constant 1 : index
    %c0_33 = arith.constant 0 : index
    %c0_34 = arith.constant 0 : index
    %39 = vector.load %arg3[%c1_32, %c0_33, %c0_34] : memref<3x8x1xf32, #tpu.memory_space<vmem>>, vector<1x8x1xf32>
    %40 = vector.shape_cast %39 : vector<1x8x1xf32> to vector<8x1xf32>
    %41 = vector.broadcast %40 : vector<8x1xf32> to vector<8x256xf32>
    %42 = arith.addf %38, %41 : vector<8x256xf32>
    %43 = tpu.concatenate %34, %42 in 0 : vector<8x256xf32>, vector<8x256xf32> -> vector<16x256xf32>
    %44 = vector.shape_cast %43 : vector<16x256xf32> to vector<2x8x256xf32>
    %c0_35 = arith.constant 0 : index
    %c16 = arith.constant 16 : index
    %c0_36 = arith.constant 0 : index
    %45 = vector.load %arg4[%c0_35, %c16, %c0_36] : memref<2x32x256xf32, #tpu.memory_space<vmem>>, vector<2x8x256xf32>
    tpu.vector_store %arg4[%c0_35, %c16, %c0_36], %44 {strides = array<i32>} : memref<2x32x256xf32, #tpu.memory_space<vmem>>, vector<2x8x256xf32>,
    %46 = vector.extract_strided_slice %5 {offsets = [0, 512], sizes = [16, 256], strides = [1, 1]} : vector<16x768xf32> to vector<16x256xf32>
    %c2 = arith.constant 2 : index
    %c0_37 = arith.constant 0 : index
    %c0_38 = arith.constant 0 : index
    %47 = vector.load %arg2[%c2, %c0_37, %c0_38] : memref<3x8x8xf32, #tpu.memory_space<vmem>>, vector<1x8x8xf32>
    %48 = vector.shape_cast %47 : vector<1x8x8xf32> to vector<8x8xf32>
    %49 = vector.extract_strided_slice %46 {offsets = [0, 0], sizes = [8, 256], strides = [1, 1]} : vector<16x256xf32> to vector<8x256xf32>
    %cst_39 = arith.constant dense<0.000000e+00> : vector<8x256xf32>
    %50 = tpu.matmul %48, %49, %cst_39 {dimension_numbers = #tpu.dot_dimension_numbers<[1], [0], [0], [1], [0, 0, 1, 1], [], []>} : vector<8x8xf32>, vector<8x256xf32>, vector<8x256xf32> -> vector<8x256xf32>
    %c2_40 = arith.constant 2 : index
    %c0_41 = arith.constant 0 : index
    %c0_42 = arith.constant 0 : index
    %51 = vector.load %arg3[%c2_40, %c0_41, %c0_42] : memref<3x8x1xf32, #tpu.memory_space<vmem>>, vector<1x8x1xf32>
    %52 = vector.shape_cast %51 : vector<1x8x1xf32> to vector<8x1xf32>
    %53 = vector.broadcast %52 : vector<8x1xf32> to vector<8x256xf32>
    %54 = arith.addf %50, %53 : vector<8x256xf32>
    %c2_43 = arith.constant 2 : index
    %c0_44 = arith.constant 0 : index
    %c0_45 = arith.constant 0 : index
    %55 = vector.load %arg2[%c2_43, %c0_44, %c0_45] : memref<3x8x8xf32, #tpu.memory_space<vmem>>, vector<1x8x8xf32>
    %56 = vector.shape_cast %55 : vector<1x8x8xf32> to vector<8x8xf32>
    %57 = vector.extract_strided_slice %46 {offsets = [8, 0], sizes = [8, 256], strides = [1, 1]} : vector<16x256xf32> to vector<8x256xf32>
    %cst_46 = arith.constant dense<0.000000e+00> : vector<8x256xf32>
    %58 = tpu.matmul %56, %57, %cst_46 {dimension_numbers = #tpu.dot_dimension_numbers<[1], [0], [0], [1], [0, 0, 1, 1], [], []>} : vector<8x8xf32>, vector<8x256xf32>, vector<8x256xf32> -> vector<8x256xf32>
    %c2_47 = arith.constant 2 : index
    %c0_48 = arith.constant 0 : index
    %c0_49 = arith.constant 0 : index
    %59 = vector.load %arg3[%c2_47, %c0_48, %c0_49] : memref<3x8x1xf32, #tpu.memory_space<vmem>>, vector<1x8x1xf32>
    %60 = vector.shape_cast %59 : vector<1x8x1xf32> to vector<8x1xf32>
    %61 = vector.broadcast %60 : vector<8x1xf32> to vector<8x256xf32>
    %62 = arith.addf %58, %61 : vector<8x256xf32>
    %63 = tpu.concatenate %54, %62 in 0 : vector<8x256xf32>, vector<8x256xf32> -> vector<16x256xf32>
    %64 = vector.shape_cast %63 : vector<16x256xf32> to vector<2x8x256xf32>
    %c0_50 = arith.constant 0 : index
    %c24 = arith.constant 24 : index
    %c0_51 = arith.constant 0 : index
    %65 = vector.load %arg4[%c0_50, %c24, %c0_51] : memref<2x32x256xf32, #tpu.memory_space<vmem>>, vector<2x8x256xf32>
    tpu.vector_store %arg4[%c0_50, %c24, %c0_51], %64 {strides = array<i32>} : memref<2x32x256xf32, #tpu.memory_space<vmem>>, vector<2x8x256xf32>,
    return
  }
}

</mosaic_0001>

<bundles_post_ra>
// kernel: tpu_custom_call.1
= control target key start
LH: loop header
LB: loop body
LE: loop exit
PB: predicated region body
PF: predicated region fallthrough
CT: control target
= control target key end

     0   :  { %9 = vsyncpa [#allocation3], 0  ;;  %s1703_s0 = inlined_call_operand.hbm [shape: f32[16,256], index: 0, kind: input, shape index: {}]   ;;  %s1704_s1 = inlined_call_operand.hbm [shape: bf16[256,768], index: 1, kind: input, shape index: {}]   ;;  %s1705_s2 = inlined_call_operand.vmem [shape: f32[3,8,8], index: 2, kind: input, shape index: {}]   ;;  %s1706_s3 = inlined_call_operand.vmem [shape: f32[3,8,1], index: 3, kind: input, shape index: {}]   ;;  %s1707_s4 = inlined_call_operand.hbm [shape: f32[2,32,256], index: 4, kind: output, shape index: {}]  }
   0x1   :  { %10 = vsyncpa [#allocation6], 0 }
   0x2   :  { %11 = vsyncpa [#allocation4], 0  ;;  %s1585_s15 = smov [#allocation2]   ;;  %s1513_s19 = scalar_lea.hbm %s1703_s0, 512 }
   0x3   :  { %s17_s16 = sshll.u32 %s1585_s15, 4  ;;  %p1514_p0 = scmp.ne.s32.totalorder %s1703_s0, %s1513_s19  ;;  %s18_s16 = int_to_ptr.vmem [resolvable:$true] %s17_s16 }
   0x4   :  { %p1517_p1 = scmp.lt.u32.totalorder %s1513_s19, %s1703_s0 }
   0x6   :  { %p1519_p2 = pnand %p1517_p1, %p1514_p0 }
   0x8   :  { %1522 = shalt.err (!%p1519_p2)
}
   0x9   :  { %s1523_s24 = scalar_lea.vmem %s18_s16, 512  ;;  %p1528_p4 = scmp.lt.s32.totalorder %s18_s16, %s18_s16 }
   0xa   :  { %p1524_p3 = scmp.ne.s32.totalorder %s18_s16, %s1523_s24  ;;  %p1529_p5 = scmp.lt.s32.totalorder %s1523_s24, %s1523_s24 }
   0xc   :  { %p1530_p6 = por %p1529_p5, %p1528_p4 }
   0xe   :  { %p1531_p7 = pnand %p1530_p6, %p1524_p3 }
  0x10   :  { %1534 = shalt.err (!%p1531_p7)
}
  0x11   :  { %s1586_s25 = smov 256   ;;  %s1587_s26 = smov 16  }
  0x12   :  { %23 = dma.hbm_to_vmem [thread:$0]  %s1703_s0, 512, %s18_s16, [#allocation3], %s1586_s25, %s1586_s25, %s1587_s26  }
  0x13   :  { %s1588_s29 = smov [#allocation5]   ;;  %s1535_s7 = scalar_lea.hbm %s1704_s1, 12288 }
  0x14   :  { %s29_s30 = sshll.u32 %s1588_s29, 4  ;;  %p1536_p8 = scmp.ne.s32.totalorder %s1704_s1, %s1535_s7  ;;  %s30_s30 = int_to_ptr.vmem [resolvable:$true] %s29_s30 }
  0x15   :  { %p1539_p9 = scmp.lt.u32.totalorder %s1535_s7, %s1704_s1 }
  0x17   :  { %p1541_p10 = pnand %p1539_p9, %p1536_p8 }
  0x19   :  { %1544 = shalt.err (!%p1541_p10)
}
  0x1a   :  { %s1545_s12 = scalar_lea.vmem %s30_s30, 12288  ;;  %p1550_p12 = scmp.lt.s32.totalorder %s30_s30, %s30_s30 }
  0x1b   :  { %p1546_p11 = scmp.ne.s32.totalorder %s30_s30, %s1545_s12  ;;  %p1551_p13 = scmp.lt.s32.totalorder %s1545_s12, %s1545_s12 }
  0x1d   :  { %p1552_p0 = por %p1551_p13, %p1550_p12 }
  0x1f   :  { %p1553_p1 = pnand %p1552_p0, %p1546_p11 }
  0x21   :  { %1556 = shalt.err (!%p1553_p1)
}
  0x22   :  { %s1589_s0 = smov 384   ;;  %s1590_s13 = smov 24  }
  0x23   :  { %35 = dma.hbm_to_vmem [thread:$0]  %s1704_s1, 12288, %s30_s30, [#allocation6], %s1589_s0, %s1589_s0, %s1590_s13  }
  0x24   :  { %1579 = dma.done.wait [#allocation3], 512  }
  0x25   :  { %1580 = vsyncadd [#allocation3], 4294966784 }
  0x26   :  { %1581 = dma.done.wait [#allocation6], 12288  }
  0x27   :  { %1582 = vsyncadd [#allocation6], 4294955008  ;;  %v1369_v0 = vld [vmem:[#allocation5 + $0x4] ss:$24 sps:$4 sm:$0xff]   ;;  %v1371_v1 = vld [vmem:[#allocation5] ss:$24 sps:$4 sm:$0xff]  }
  0x28   :  { %632 = vmatprep.subr.bf16.mxu0 %v1369_v0  ;;  %v1372_v2 = vld [vmem:[#allocation5 + $0x34] ss:$24 sps:$4 sm:$0xff]   ;;  %v1374_v3 = vld [vmem:[#allocation5 + $0x30] ss:$24 sps:$4 sm:$0xff]   ;;  %v1375_v4 = vld [vmem:[#allocation5 + $0x64] ss:$24 sps:$4 sm:$0xff]  }
  0x29   :  { %633 = vmatpush1.bf16.msra.mxu0 %v1371_v1  ;;  %v1377_v5 = vld [vmem:[#allocation5 + $0x60] ss:$24 sps:$4 sm:$0xff]   ;;  %v1378_v6 = vld [vmem:[#allocation5 + $0x94] ss:$24 sps:$4 sm:$0xff]   ;;  %v1380_v7 = vld [vmem:[#allocation5 + $0x90] ss:$24 sps:$4 sm:$0xff]  }
  0x2a   :  { %634 = vmatprep.subr.bf16.mxu0 %v1372_v2  ;;  %v1381_v8 = vld [vmem:[#allocation5 + $0xc4] ss:$24 sps:$4 sm:$0xff]   ;;  %v1383_v9 = vld [vmem:[#allocation5 + $0xc0] ss:$24 sps:$4 sm:$0xff]   ;;  %v1384_v10 = vld [vmem:[#allocation5 + $0xf4] ss:$24 sps:$4 sm:$0xff]  }
  0x2b   :  { %v1386_v11 = vld [vmem:[#allocation5 + $0xf0] ss:$24 sps:$4 sm:$0xff]   ;;  %v1410_v12 = vld [vmem:[#allocation5 + $0xc] ss:$24 sps:$4 sm:$0xff]   ;;  %v1416_v15 = vld [vmem:[#allocation5 + $0x3c] ss:$24 sps:$4 sm:$0xff]  }
  0x2c   :  { %v1413_v13 = vld [vmem:[#allocation5 + $0x8] ss:$24 sps:$4 sm:$0xff]   ;;  %v1387_v14 = vld [vmem:[#allocation5 + $0x124] ss:$24 sps:$4 sm:$0xff]   ;;  %675 = vmatprep.subr.bf16.mxu1 %v1410_v12  ;;  %v1419_v16 = vld [vmem:[#allocation5 + $0x38] ss:$24 sps:$4 sm:$0xff]  }
  0x2d   :  { %635 = vmatpush1.bf16.msra.mxu0 %v1374_v3  ;;  %676 = vmatpush1.bf16.msra.mxu1 %v1413_v13  ;;  %v1389_v17 = vld [vmem:[#allocation5 + $0x120] ss:$24 sps:$4 sm:$0xff]   ;;  %v1390_v18 = vld [vmem:[#allocation5 + $0x154] ss:$24 sps:$4 sm:$0xff]   ;;  %v1392_v20 = vld [vmem:[#allocation5 + $0x150] ss:$24 sps:$4 sm:$0xff]  }
  0x2e   :  { %636 = vmatprep.subr.bf16.mxu0 %v1375_v4  ;;  %677 = vmatprep.subr.bf16.mxu1 %v1416_v15  ;;  %v1422_v19 = vld [vmem:[#allocation5 + $0x6c] ss:$24 sps:$4 sm:$0xff]   ;;  %v1425_v21 = vld [vmem:[#allocation5 + $0x68] ss:$24 sps:$4 sm:$0xff]   ;;  %v49_v23 = vld [vmem:[#allocation2 + $0x18] sm:$0xff]  ;;  %vm768_vm0 = vcmask 64512  }
  0x2f   :  { %v47_v22 = vld [vmem:[#allocation2 + $0x8] sm:$0xff]  ;;  %53 = vst [vmem:[#allocation7 + $0x48] sm:$0xff] %v49_v23  ;;  %v1648_v25 = vld [vmem:[#allocation2] sm:$0xff]  ;;  %v1650_v26 = vld [vmem:[#allocation2 + $0x10] sm:$0xff] }
  0x30   :  { %51 = vst [vmem:[#allocation7 + $0x8] sm:$0xff] %v47_v22  ;;  %v1646_v24 = vpack.c.bf16 %v49_v23, %v47_v22  ;;  %50 = vst [vmem:[#allocation7] sm:$0xff] %v1648_v25  ;;  %v1426_v27 = vld [vmem:[#allocation5 + $0x9c] ss:$24 sps:$4 sm:$0xff]   ;;  %v1431_v29 = vld [vmem:[#allocation5 + $0x98] ss:$24 sps:$4 sm:$0xff]   ;;  %v1658_v61 = vpack.c.bf16 %v1650_v26, %v1648_v25 }
  0x31   :  { %637 = vmatpush1.bf16.msra.mxu0 %v1377_v5  ;;  %678 = vmatpush1.bf16.msra.mxu1 %v1419_v16  ;;  %52 = vst [vmem:[#allocation7 + $0x40] sm:$0xff] %v1650_v26  ;;  %v1393_v28 = vld [vmem:[#allocation5 + $0x184] ss:$24 sps:$4 sm:$0xff]   ;;  %v1395_v30 = vld [vmem:[#allocation5 + $0x180] ss:$24 sps:$4 sm:$0xff]  }
  0x32   :  { %638 = vmatprep.subr.bf16.mxu0 %v1378_v6  ;;  %679 = vmatprep.subr.bf16.mxu1 %v1422_v19  ;;  %v1432_v31 = vld [vmem:[#allocation5 + $0xcc] ss:$24 sps:$4 sm:$0xff]   ;;  %v1398_v33 = vld [vmem:[#allocation5 + $0x1b0] ss:$24 sps:$4 sm:$0xff]   ;;  %v1438_v35 = vld [vmem:[#allocation5 + $0xfc] ss:$24 sps:$4 sm:$0xff]  }
  0x33   :  { %664 = vmatprep.mubr.bf16.mxu0 %v1646_v24  ;;  %707 = vmatprep.mubr.bf16.mxu1 %v1646_v24  ;;  %v1396_v32 = vld [vmem:[#allocation5 + $0x1b4] ss:$24 sps:$4 sm:$0xff]   ;;  %v1437_v34 = vld [vmem:[#allocation5 + $0xc8] ss:$24 sps:$4 sm:$0xff]   ;;  %v1399_v36 = vld [vmem:[#allocation5 + $0x1e4] ss:$24 sps:$4 sm:$0xff]  }
  0x34   :  { %v1443_v37 = vld [vmem:[#allocation5 + $0xf8] ss:$24 sps:$4 sm:$0xff]   ;;  %v1444_v39 = vld [vmem:[#allocation5 + $0x12c] ss:$24 sps:$4 sm:$0xff]   ;;  %v1449_v42 = vld [vmem:[#allocation5 + $0x128] ss:$24 sps:$4 sm:$0xff]  }
  0x35   :  { %639 = vmatpush1.bf16.msra.mxu0 %v1380_v7  ;;  %680 = vmatpush1.bf16.msra.mxu1 %v1425_v21  ;;  %v1401_v38 = vld [vmem:[#allocation5 + $0x1e0] ss:$24 sps:$4 sm:$0xff]   ;;  %v1402_v40 = vld [vmem:[#allocation5 + $0x214] ss:$24 sps:$4 sm:$0xff]   ;;  %v1404_v41 = vld [vmem:[#allocation5 + $0x210] ss:$24 sps:$4 sm:$0xff]  }
  0x36   :  { %640 = vmatprep.subr.bf16.mxu0 %v1381_v8  ;;  %681 = vmatprep.subr.bf16.mxu1 %v1426_v27  ;;  %v1450_v43 = vld [vmem:[#allocation5 + $0x15c] ss:$24 sps:$4 sm:$0xff]   ;;  %v1455_v45 = vld [vmem:[#allocation5 + $0x158] ss:$24 sps:$4 sm:$0xff]   ;;  %v1456_v47 = vld [vmem:[#allocation5 + $0x18c] ss:$24 sps:$4 sm:$0xff]  }
  0x37   :  { %v1405_v44 = vld [vmem:[#allocation5 + $0x244] ss:$24 sps:$4 sm:$0xff]   ;;  %v1407_v46 = vld [vmem:[#allocation5 + $0x240] ss:$24 sps:$4 sm:$0xff]   ;;  %v1408_v48 = vld [vmem:[#allocation5 + $0x274] ss:$24 sps:$4 sm:$0xff]  }
  0x38   :  { %v1412_v49 = vld [vmem:[#allocation5 + $0x270] ss:$24 sps:$4 sm:$0xff]   ;;  %v1462_v51 = vld [vmem:[#allocation5 + $0x1bc] ss:$24 sps:$4 sm:$0xff]   ;;  %v1418_v54 = vld [vmem:[#allocation5 + $0x2a0] ss:$24 sps:$4 sm:$0xff]  }
  0x39   :  { %641 = vmatpush1.bf16.msra.mxu0 %v1383_v9  ;;  %682 = vmatpush1.bf16.msra.mxu1 %v1431_v29  ;;  %v1461_v50 = vld [vmem:[#allocation5 + $0x188] ss:$24 sps:$4 sm:$0xff]   ;;  %v1414_v52 = vld [vmem:[#allocation5 + $0x2a4] ss:$24 sps:$4 sm:$0xff]   ;;  %v1467_v53 = vld [vmem:[#allocation5 + $0x1b8] ss:$24 sps:$4 sm:$0xff]  }
  0x3a   :  { %642 = vmatprep.subr.bf16.mxu0 %v1384_v10  ;;  %683 = vmatprep.subr.bf16.mxu1 %v1432_v31  ;;  %v1468_v55 = vld [vmem:[#allocation5 + $0x1ec] ss:$24 sps:$4 sm:$0xff]   ;;  %v1424_v57 = vld [vmem:[#allocation5 + $0x2d0] ss:$24 sps:$4 sm:$0xff]   ;;  %v1474_v59 = vld [vmem:[#allocation5 + $0x21c] ss:$24 sps:$4 sm:$0xff]  }
  0x3b   :  { %v1420_v56 = vld [vmem:[#allocation5 + $0x2d4] ss:$24 sps:$4 sm:$0xff]   ;;  %v1473_v58 = vld [vmem:[#allocation5 + $0x1e8] ss:$24 sps:$4 sm:$0xff]   ;;  %v1479_v62 = vld [vmem:[#allocation5 + $0x218] ss:$24 sps:$4 sm:$0xff]  }
  0x3c   :  { %v1430_v60 = vld [vmem:[#allocation5 + $0x14] ss:$24 sps:$4 sm:$0xff]   ;;  %v1428_v63 = vld [vmem:[#allocation5 + $0x10] ss:$24 sps:$4 sm:$0xff]   ;;  %v1436_v1 = vld [vmem:[#allocation5 + $0x44] ss:$24 sps:$4 sm:$0xff]  }
  0x3d   :  { %643 = vmatpush1.bf16.msra.mxu0 %v1386_v11  ;;  %684 = vmatpush1.bf16.msra.mxu1 %v1437_v34  ;;  %v1480_v0 = vld [vmem:[#allocation5 + $0x24c] ss:$24 sps:$4 sm:$0xff]   ;;  %v1485_v2 = vld [vmem:[#allocation5 + $0x248] ss:$24 sps:$4 sm:$0xff]   ;;  %v1486_v4 = vld [vmem:[#allocation5 + $0x27c] ss:$24 sps:$4 sm:$0xff]  }
  0x3e   :  { %644 = vmatprep.subr.bf16.mxu0 %v1387_v14  ;;  %685 = vmatprep.subr.bf16.mxu1 %v1438_v35  ;;  %v1434_v3 = vld [vmem:[#allocation5 + $0x40] ss:$24 sps:$4 sm:$0xff]   ;;  %v1442_v5 = vld [vmem:[#allocation5 + $0x74] ss:$24 sps:$4 sm:$0xff]   ;;  %v1440_v7 = vld [vmem:[#allocation5 + $0x70] ss:$24 sps:$4 sm:$0xff]  }
  0x3f   :  { %v1491_v6 = vld [vmem:[#allocation5 + $0x278] ss:$24 sps:$4 sm:$0xff]   ;;  %v1492_v8 = vld [vmem:[#allocation5 + $0x2ac] ss:$24 sps:$4 sm:$0xff]   ;;  %v1497_v10 = vld [vmem:[#allocation5 + $0x2a8] ss:$24 sps:$4 sm:$0xff]  }
  0x40   :  { %v1448_v9 = vld [vmem:[#allocation5 + $0xa4] ss:$24 sps:$4 sm:$0xff]   ;;  %v1446_v11 = vld [vmem:[#allocation5 + $0xa0] ss:$24 sps:$4 sm:$0xff]   ;;  %v1454_v13 = vld [vmem:[#allocation5 + $0xd4] ss:$24 sps:$4 sm:$0xff]  }
  0x41   :  { %645 = vmatpush1.bf16.msra.mxu0 %v1389_v17  ;;  %686 = vmatpush1.bf16.msra.mxu1 %v1443_v37  ;;  %v1498_v12 = vld [vmem:[#allocation5 + $0x2dc] ss:$24 sps:$4 sm:$0xff]   ;;  %v1503_v14 = vld [vmem:[#allocation5 + $0x2d8] ss:$24 sps:$4 sm:$0xff]  }
  0x42   :  { %646 = vmatprep.subr.bf16.mxu0 %v1390_v18  ;;  %687 = vmatprep.subr.bf16.mxu1 %v1444_v39  ;;  %v1452_v15 = vld [vmem:[#allocation5 + $0xd0] ss:$24 sps:$4 sm:$0xff]   ;;  %v1460_v16 = vld [vmem:[#allocation5 + $0x104] ss:$24 sps:$4 sm:$0xff]   ;;  %v1458_v17 = vld [vmem:[#allocation5 + $0x100] ss:$24 sps:$4 sm:$0xff]  }
  0x43   :  { %v1466_v18 = vld [vmem:[#allocation5 + $0x134] ss:$24 sps:$4 sm:$0xff]   ;;  %v1464_v19 = vld [vmem:[#allocation5 + $0x130] ss:$24 sps:$4 sm:$0xff]   ;;  %v1470_v21 = vld [vmem:[#allocation5 + $0x160] ss:$24 sps:$4 sm:$0xff]  }
  0x44   :  { %v1478_v22 = vld [vmem:[#allocation5 + $0x194] ss:$24 sps:$4 sm:$0xff]   ;;  %v1476_v23 = vld [vmem:[#allocation5 + $0x190] ss:$24 sps:$4 sm:$0xff]   ;;  %v1482_v25 = vld [vmem:[#allocation5 + $0x1c0] ss:$24 sps:$4 sm:$0xff]  }
  0x45   :  { %647 = vmatpush1.bf16.msra.mxu0 %v1392_v20  ;;  %688 = vmatpush1.bf16.msra.mxu1 %v1449_v42  ;;  %v1472_v20 = vld [vmem:[#allocation5 + $0x164] ss:$24 sps:$4 sm:$0xff]   ;;  %v1490_v26 = vld [vmem:[#allocation5 + $0x1f4] ss:$24 sps:$4 sm:$0xff]   ;;  %v1488_v27 = vld [vmem:[#allocation5 + $0x1f0] ss:$24 sps:$4 sm:$0xff]  }
  0x46   :  { %648 = vmatprep.subr.bf16.mxu0 %v1393_v28  ;;  %689 = vmatprep.subr.bf16.mxu1 %v1450_v43  ;;  %v1496_v28 = vld [vmem:[#allocation5 + $0x224] ss:$24 sps:$4 sm:$0xff]   ;;  %v1494_v29 = vld [vmem:[#allocation5 + $0x220] ss:$24 sps:$4 sm:$0xff]   ;;  %v1500_v31 = vld [vmem:[#allocation5 + $0x250] ss:$24 sps:$4 sm:$0xff]  }
  0x47   :  { %v1509_v34 = vld [vmem:[#allocation5 + $0x2b4] ss:$24 sps:$4 sm:$0xff]   ;;  %v1507_v35 = vld [vmem:[#allocation5 + $0x2b0] ss:$24 sps:$4 sm:$0xff]   ;;  %v1510_v37 = vld [vmem:[#allocation5 + $0x2e0] ss:$24 sps:$4 sm:$0xff]  }
  0x48   :  { %v762_v39 = vld [vmem:[%s1706_s3] sm:$0xff]  ;;  %v1351_v42 = vld [vmem:[%s1706_s3 + $0x8] sm:$0xff] }
  0x49   :  { %649 = vmatpush1.bf16.msra.mxu0 %v1395_v30  ;;  %690 = vmatpush1.bf16.msra.mxu1 %v1455_v45  ;;  %v1502_v30 = vld [vmem:[#allocation5 + $0x254] ss:$24 sps:$4 sm:$0xff]   ;;  %v761_v45 = vld [vmem:[%s1705_s2] sm:$0xff] }
  0x4a   :  { %650 = vmatprep.subr.bf16.mxu0 %v1396_v32  ;;  %691 = vmatprep.subr.bf16.mxu1 %v1456_v47  ;;  %v1506_v32 = vld [vmem:[#allocation5 + $0x284] ss:$24 sps:$4 sm:$0xff]  }
  0x4d   :  { %651 = vmatpush1.bf16.msra.mxu0 %v1398_v33  ;;  %692 = vmatpush1.bf16.msra.mxu1 %v1461_v50  ;;  %v1504_v33 = vld [vmem:[#allocation5 + $0x280] ss:$24 sps:$4 sm:$0xff]   ;;  %v1350_v50 = vld [vmem:[%s1705_s2 + $0x8] sm:$0xff] }
  0x4e   :  { %652 = vmatprep.subr.bf16.mxu0 %v1399_v36  ;;  %693 = vmatprep.subr.bf16.mxu1 %v1462_v51  ;;  %v1512_v36 = vld [vmem:[#allocation5 + $0x2e4] ss:$24 sps:$4 sm:$0xff]  }
  0x51   :  { %653 = vmatpush1.bf16.msra.mxu0 %v1401_v38  ;;  %694 = vmatpush1.bf16.msra.mxu1 %v1467_v53  ;;  %v1591_v38 = vmov 0.0  }
  0x52   :  { %654 = vmatprep.subr.bf16.mxu0 %v1402_v40  ;;  %695 = vmatprep.subr.bf16.mxu1 %v1468_v55  ;;  %v1355_v40 = vld [vmem:[%s1706_s3 + $0x10] sm:$0xff] }
  0x53   :  { %v1354_v55 = vld [vmem:[%s1705_s2 + $0x10] sm:$0xff]  ;;  %s1593_s2 = smov [#allocation7]  }
  0x54   :  { %s1239_s28 = sshll.u32 %s1593_s2, 4  ;;  %s1240_s28 = int_to_ptr.vmem [resolvable:$true] %s1239_s28 }
  0x55   :  { %655 = vmatpush1.bf16.msra.mxu0 %v1404_v41  ;;  %696 = vmatpush1.bf16.msra.mxu1 %v1473_v58  ;;  %v1592_v41 = vmov 0   ;;  %s1557_s29 = scalar_lea.vmem %s1240_s28, 2048  ;;  %p1562_p3 = scmp.lt.s32.totalorder %s1240_s28, %s1240_s28 }
  0x56   :  { %656 = vmatprep.subr.bf16.mxu0 %v1405_v44  ;;  %697 = vmatprep.subr.bf16.mxu1 %v1474_v59  ;;  %p1558_p2 = scmp.ne.s32.totalorder %s1240_s28, %s1557_s29  ;;  %p1563_p4 = scmp.lt.s32.totalorder %s1557_s29, %s1557_s29 }
  0x57   :  { %1367 = vset.pattern.permute.xlu0 %v1592_v41  ;;  %1368 = vset.pattern.permute.xlu1 %v1592_v41 }
  0x58   :  { %765 = vperm.xlu0 %1367, %v762_v39   ;;  %1082 = vperm.xlu1 %1368, %v1355_v40   ;;  %p1564_p5 = por %p1563_p4, %p1562_p3 }
  0x59   :  { %657 = vmatpush1.bf16.msra.mxu0 %v1407_v46  ;;  %698 = vmatpush1.bf16.msra.mxu1 %v1479_v62 }
  0x5a   :  { %658 = vmatprep.subr.bf16.mxu0 %v1408_v48  ;;  %699 = vmatprep.subr.bf16.mxu1 %v1480_v0  ;;  %p1565_p6 = pnand %p1564_p5, %p1558_p2 }
  0x5c   :  { %924 = vperm.xlu0 %1367, %v1351_v42  }
  0x5d   :  { %659 = vmatpush1.bf16.msra.mxu0 %v1412_v49  ;;  %700 = vmatpush1.bf16.msra.mxu1 %v1485_v2 }
  0x5e   :  { %660 = vmatprep.subr.bf16.mxu0 %v1414_v52  ;;  %701 = vmatprep.subr.bf16.mxu1 %v1486_v4 }
  0x61   :  { %661 = vmatpush1.bf16.msra.mxu0 %v1418_v54  ;;  %702 = vmatpush1.bf16.msra.mxu1 %v1491_v6 }
  0x62   :  { %662 = vmatprep.subr.bf16.mxu0 %v1420_v56  ;;  %703 = vmatprep.subr.bf16.mxu1 %v1492_v8 }
  0x65   :  { %663 = vmatpush1.bf16.msra.mxu0 %v1424_v57  ;;  %704 = vmatpush1.bf16.msra.mxu1 %v1497_v10 }
  0x66   :  { %718 = vmatprep.subr.bf16.mxu0 %v1430_v60  ;;  %705 = vmatprep.subr.bf16.mxu1 %v1498_v12 }
  0x68   :  { %665 = vmatmul.mubr.bf16.vlgmr.msra.gmra.mrb[0].mxu0 %v1658_v61 }
  0x69   :  { %719 = vmatpush1.bf16.msra.mxu0 %v1428_v63  ;;  %750 = vmatprep.mubr.bf16.mxu0 %v1646_v24  ;;  %v1484_v24 = vld [vmem:[#allocation5 + $0x1c4] ss:$24 sps:$4 sm:$0xff]  }
  0x6a   :  { %720 = vmatprep.subr.bf16.mxu0 %v1436_v1  ;;  %706 = vmatpush1.bf16.msra.mxu1 %v1503_v14 }
  0x6d   :  { %721 = vmatpush1.bf16.msra.mxu0 %v1434_v3  ;;  %708 = vmatmul.mubr.bf16.vlgmr.msra.gmra.mrb[0].mxu1 %v1658_v61 }
  0x6e   :  { %722 = vmatprep.subr.bf16.mxu0 %v1442_v5  ;;  %836 = vmatprep.mubr.f32.mxu1 %v1591_v38 }
  0x71   :  { %723 = vmatpush1.bf16.msra.mxu0 %v1440_v7 }
  0x72   :  { %724 = vmatprep.subr.bf16.mxu0 %v1448_v9 }
  0x75   :  { %725 = vmatpush1.bf16.msra.mxu0 %v1446_v11 }
  0x76   :  { %726 = vmatprep.subr.bf16.mxu0 %v1454_v13 }
  0x79   :  { %727 = vmatpush1.bf16.msra.mxu0 %v1452_v15 }
  0x7a   :  { %728 = vmatprep.subr.bf16.mxu0 %v1460_v16 }
  0x7d   :  { %729 = vmatpush1.bf16.msra.mxu0 %v1458_v17 }
  0x7e   :  { %730 = vmatprep.subr.bf16.mxu0 %v1466_v18 }
  0x81   :  { %731 = vmatpush1.bf16.msra.mxu0 %v1464_v19 }
  0x82   :  { %732 = vmatprep.subr.bf16.mxu0 %v1472_v20 }
  0x85   :  { %733 = vmatpush1.bf16.msra.mxu0 %v1470_v21 }
  0x86   :  { %734 = vmatprep.subr.bf16.mxu0 %v1478_v22 }
  0x89   :  { %735 = vmatpush1.bf16.msra.mxu0 %v1476_v23 }
  0x8a   :  { %736 = vmatprep.subr.bf16.mxu0 %v1484_v24 }
  0x8d   :  { %737 = vmatpush1.bf16.msra.mxu0 %v1482_v25 }
  0x8e   :  { %738 = vmatprep.subr.bf16.mxu0 %v1490_v26 }
  0x91   :  { %739 = vmatpush1.bf16.msra.mxu0 %v1488_v27 }
  0x92   :  { %740 = vmatprep.subr.bf16.mxu0 %v1496_v28 }
  0x95   :  { %741 = vmatpush1.bf16.msra.mxu0 %v1494_v29 }
  0x96   :  { %742 = vmatprep.subr.bf16.mxu0 %v1502_v30 }
  0x99   :  { %743 = vmatpush1.bf16.msra.mxu0 %v1500_v31 }
  0x9a   :  { %744 = vmatprep.subr.bf16.mxu0 %v1506_v32 }
  0x9d   :  { %745 = vmatpush1.bf16.msra.mxu0 %v1504_v33 }
  0x9e   :  { %746 = vmatprep.subr.bf16.mxu0 %v1509_v34 }
  0xa1   :  { %747 = vmatpush1.bf16.msra.mxu0 %v1507_v35 }
  0xa2   :  { %748 = vmatprep.subr.bf16.mxu0 %v1512_v36 }
  0xa5   :  { %749 = vmatpush1.bf16.msra.mxu0 %v1510_v37 }
  0xa8   :  { %751 = vmatmul.mubr.bf16.vlgmr.msra.gmra.mrb[4].mxu0 %v1658_v61 }
  0xd7   :  { %v766_v58 = vpop.permute.xlu0 %765  ;;  %v1083_v12 = vpop.permute.xlu1 %1082 }
  0xdb   :  { %v925_v3 = vpop.permute.xlu0 %924 }
 0x13b   :  { %v666_v43 = vpop.f32.mrb[0].mxu0 }
 0x13c   :  { %v668_v44 = vpop.f32.mrb[1].mxu0 }
 0x13d   :  { %v670_v46 = vpop.f32.mrb[2].mxu0  ;;  %772 = vmatprep.subr.mxu1 %v668_v44 }
 0x13e   :  { %v672_v47 = vpop.f32.mrb[3].mxu0  ;;  %773 = vmatpush1.msra.mxu1 %v666_v43 }
 0x13f   :  { %843 = vmatprep.subr.mxu1 %v672_v47  ;;  %1348 = vmatmul.mubr.msk.f32.vlgmr.msra.gmra.mrb[4].mxu1 %vm768_vm0, %v761_v45 }
 0x140   :  { %844 = vmatpush1.msra.mxu1 %v670_v46  ;;  %907 = vmatprep.mubr.f32.mxu1 %v1591_v38  ;;  %v709_v48 = vpop.f32.mrb[0].mxu1 }
 0x141   :  { %v711_v49 = vpop.f32.mrb[1].mxu1 }
 0x142   :  { %v713_v51 = vpop.f32.mrb[2].mxu1  ;;  %930 = vmatprep.subr.mxu1 %v711_v49 }
 0x143   :  { %1349 = vmatmul.mubr.msk.f32.vlgmr.msra.gmra.mrb[6].mxu1 %vm768_vm0, %v761_v45  ;;  %v715_v52 = vpop.f32.mrb[3].mxu1 }
 0x144   :  { %994 = vmatprep.mubr.f32.mxu1 %v1591_v38  ;;  %931 = vmatpush1.msra.mxu1 %v709_v48 }
 0x145   :  { %1001 = vmatprep.subr.mxu1 %v715_v52 }
 0x147   :  { %1352 = vmatmul.mubr.msk.f32.vlgmr.msra.gmra.mrb[8].mxu1 %vm768_vm0, %v1350_v50 }
 0x148   :  { %1002 = vmatpush1.msra.mxu1 %v713_v51  ;;  %1065 = vmatprep.mubr.f32.mxu1 %v1591_v38 }
 0x14b   :  { %1353 = vmatmul.mubr.msk.f32.vlgmr.msra.gmra.mrb[10].mxu1 %vm768_vm0, %v1350_v50 }
 0x14c   :  { %1152 = vmatprep.mubr.f32.mxu1 %v1591_v38 }
 0x17b   :  { %v752_v53 = vpop.f32.mrb[4].mxu0 }
 0x17c   :  { %v754_v54 = vpop.f32.mrb[5].mxu0 }
 0x17d   :  { %v756_v56 = vpop.f32.mrb[6].mxu0  ;;  %1088 = vmatprep.subr.mxu1 %v754_v54 }
 0x17e   :  { %v758_v57 = vpop.f32.mrb[7].mxu0  ;;  %1089 = vmatpush1.msra.mxu1 %v752_v53 }
 0x17f   :  { %1159 = vmatprep.subr.mxu1 %v758_v57  ;;  %1356 = vmatmul.mubr.msk.f32.vlgmr.msra.gmra.mrb[12].mxu1 %vm768_vm0, %v1354_v55 }
 0x180   :  { %1160 = vmatpush1.msra.mxu1 %v756_v56  ;;  %1223 = vmatprep.mubr.f32.mxu1 %v1591_v38 }
 0x183   :  { %1357 = vmatmul.mubr.msk.f32.vlgmr.msra.gmra.mrb[14].mxu1 %vm768_vm0, %v1354_v55 }
 0x212   :  { %v838_v59 = vpop.f32.mrb[4].mxu1 }
 0x213   :  { %v839_v60 = vadd.f32 %v838_v59, %v766_v58  ;;  %v840_v61 = vpop.f32.mrb[5].mxu1 }
 0x214   :  { %v841_v62 = vadd.f32 %v840_v61, %v766_v58 }
 0x215   :  { %914 = vst [vmem:[#allocation7 + $0x10] sm:$0xff] %v839_v60 }
 0x216   :  { %915 = vst [vmem:[#allocation7 + $0x18] sm:$0xff] %v841_v62  ;;  %v909_v63 = vpop.f32.mrb[6].mxu1 }
 0x217   :  { %v910_v0 = vadd.f32 %v909_v63, %v766_v58  ;;  %v911_v1 = vpop.f32.mrb[7].mxu1 }
 0x218   :  { %v912_v2 = vadd.f32 %v911_v1, %v766_v58 }
 0x219   :  { %916 = vst [vmem:[#allocation7 + $0x50] sm:$0xff] %v910_v0 }
 0x21a   :  { %917 = vst [vmem:[#allocation7 + $0x58] sm:$0xff] %v912_v2  ;;  %v996_v4 = vpop.f32.mrb[8].mxu1 }
 0x21b   :  { %v997_v5 = vadd.f32 %v996_v4, %v925_v3  ;;  %v998_v6 = vpop.f32.mrb[9].mxu1 }
 0x21c   :  { %v999_v7 = vadd.f32 %v998_v6, %v925_v3 }
 0x21d   :  { %1072 = vst [vmem:[#allocation7 + $0x20] sm:$0xff] %v997_v5 }
 0x21e   :  { %1073 = vst [vmem:[#allocation7 + $0x28] sm:$0xff] %v999_v7  ;;  %v1067_v8 = vpop.f32.mrb[10].mxu1 }
 0x21f   :  { %v1068_v9 = vadd.f32 %v1067_v8, %v925_v3  ;;  %v1069_v10 = vpop.f32.mrb[11].mxu1 }
 0x220   :  { %v1070_v11 = vadd.f32 %v1069_v10, %v925_v3 }
 0x221   :  { %1074 = vst [vmem:[#allocation7 + $0x60] sm:$0xff] %v1068_v9 }
 0x222   :  { %1075 = vst [vmem:[#allocation7 + $0x68] sm:$0xff] %v1070_v11 }
 0x252   :  { %v1154_v13 = vpop.f32.mrb[12].mxu1 }
 0x253   :  { %v1155_v14 = vadd.f32 %v1154_v13, %v1083_v12  ;;  %v1156_v15 = vpop.f32.mrb[13].mxu1 }
 0x254   :  { %v1157_v16 = vadd.f32 %v1156_v15, %v1083_v12 }
 0x255   :  { %1230 = vst [vmem:[#allocation7 + $0x30] sm:$0xff] %v1155_v14 }
 0x256   :  { %1231 = vst [vmem:[#allocation7 + $0x38] sm:$0xff] %v1157_v16  ;;  %v1225_v17 = vpop.f32.mrb[14].mxu1 }
 0x257   :  { %v1226_v18 = vadd.f32 %v1225_v17, %v1083_v12  ;;  %v1227_v19 = vpop.f32.mrb[15].mxu1 }
 0x258   :  { %v1228_v20 = vadd.f32 %v1227_v19, %v1083_v12 }
 0x259   :  { %1232 = vst [vmem:[#allocation7 + $0x70] sm:$0xff] %v1226_v18 }
 0x25a   :  { %1233 = vst [vmem:[#allocation7 + $0x78] sm:$0xff] %v1228_v20 }
 0x25b   :  { %1568 = shalt.err (!%p1565_p6)
}
 0x25c   :  { %s1569_s6 = scalar_lea.hbm %s1707_s4, 2048 }
 0x25d   :  { %p1570_p7 = scmp.ne.s32.totalorder %s1707_s4, %s1569_s6  ;;  %p1573_p8 = scmp.lt.u32.totalorder %s1569_s6, %s1707_s4 }
 0x25f   :  { %p1575_p9 = pnand %p1573_p8, %p1570_p7 }
 0x261   :  { %1578 = shalt.err (!%p1575_p9)
}
 0x262   :  { %1245 = dma.vmem_to_hbm [thread:$0]  %s1240_s28, 2048, %s1707_s4, [#allocation4], %s1586_s25, %s1586_s25, %s1587_s26  }
 0x263   :  { %1583 = dma.done.wait [#allocation4], 2048  }
 0x264   :  { %1584 = vsyncadd [#allocation4], 4294965248 }
 0x265   :  { %1249 = vsyncpa [#allocation3], 1 }
 0x266   :  { %1250 = vsyncpa [#allocation6], 1 }
 0x267   :  { %1251 = vsyncpa [#allocation4], 1 }

</bundles_post_ra>
